<compile_context>
chip_gen: v6e
topology: v6e:2x2x1
jax: 0.10.0
libtpu: 0.0.40
codegen_flags: <defaults>
</compile_context>

<pallas_src>
import functools

import jax
import jax.numpy as jnp
from jax.experimental import pallas as pl
from jax.experimental.pallas import tpu as pltpu

_SUBLANE = 8  # f32 sublane quantum: pad feature dims / batch to multiples of 8


def _round_up(n: int, m: int) -> int:
    return ((n + m - 1) // m) * m


def _fused_mlp_kernel(x_ref, w_ref, b_ref, o_ref, *, num_layers, precision):
    """Whole MLP on one activation tile.

    x_ref: (Bt, D)     activation tile (the full array in the no-grid path)
    w_ref: (L, D, D)   stacked, zero-padded transposed weights
    b_ref: (L, 1, D)   stacked, zero-padded biases
    o_ref: (Bt, D)     output tile

    The layer loop is statically unrolled; the activation never leaves
    vregs/VMEM between layers.
    """
    h = x_ref[...]
    for i in range(num_layers):
        w = w_ref[i]      # (D, D) -- static first-axis index, free
        b = b_ref[i]      # (1, D) -- broadcasts over rows (VPU)
        h = jnp.dot(h, w, preferred_element_type=jnp.float32,
                    precision=precision) + b
        if i < num_layers - 1:
            h = jnp.maximum(h, 0.0)
    o_ref[...] = h.astype(o_ref.dtype)


def fused_mlp(x_pad, w_stack, b_stack, *, precision, batch_tile=None):
    """One pallas_call for the whole MLP.

    x_pad:   (B_pad, D) f32, B_pad % 8 == 0 (and % batch_tile == 0 if gridded)
    w_stack: (L, D, D)  f32 zero-padded W^T per layer
    b_stack: (L, 1, D)  f32 zero-padded biases
    Returns (B_pad, D) f32.
    """
    B_pad, D = x_pad.shape
    L = w_stack.shape[0]
    kernel = functools.partial(_fused_mlp_kernel, num_layers=L,
                               precision=precision)
    out_shape = jax.ShapeDtypeStruct((B_pad, D), jnp.float32)

    if batch_tile is None or B_pad <= batch_tile:
        # Tiny/medium batch: no grid, everything is a full-array VMEM block.
        return pl.pallas_call(
            kernel,
            out_shape=out_shape,
            in_specs=[pl.BlockSpec(memory_space=pltpu.MemorySpace.VMEM)] * 3,
            out_specs=pl.BlockSpec(memory_space=pltpu.MemorySpace.VMEM),
        )(x_pad, w_stack, b_stack)

    # Large batch: 1-D grid over batch tiles.  Weights/biases get constant
    # index_maps so they stay VMEM-resident across all tiles; only activation
    # tiles are double-buffered.  "parallel" lets v7x use both TensorCores.
    assert B_pad % batch_tile == 0
    grid = (B_pad // batch_tile,)
    return pl.pallas_call(
        kernel,
        out_shape=out_shape,
        grid=grid,
        in_specs=[
            pl.BlockSpec((batch_tile, D), lambda i: (i, 0)),
            pl.BlockSpec((L, D, D), lambda i: (0, 0, 0)),
            pl.BlockSpec((L, 1, D), lambda i: (0, 0, 0)),
        ],
        out_specs=pl.BlockSpec((batch_tile, D), lambda i: (i, 0)),
        compiler_params=pltpu.CompilerParams(
            dimension_semantics=("parallel",)),
    )(x_pad, w_stack, b_stack)


class FCPallas:
    """JAX/Pallas equivalent of the PyTorch FC module.

    fc[0]: Linear(input_dim, hidden_dim)
    fc[1..num_hidden_layer-1]: Linear(hidden_dim, hidden_dim)
    fc[-1]: Linear(hidden_dim, output_dim)
    forward: ReLU after every layer except the last.
    """

    def __init__(self, num_hidden_layer, input_dim, hidden_dim, output_dim, key,
                 precision=jax.lax.Precision.HIGHEST,
                 batch_tile=256, grid_batch_threshold=2048):
        self.num_layer = num_hidden_layer + 1
        self.input_dim = input_dim
        self.output_dim = output_dim
        self.precision = precision
        self.batch_tile = batch_tile
        self.grid_batch_threshold = grid_batch_threshold

        dims = [input_dim] + [hidden_dim] * num_hidden_layer + [output_dim]
        # Uniform padded width: max feature dim rounded up to the 8-sublane
        # quantum (NOT 128 -- lane widths < 128 cost nothing at these sizes).
        D = max(_round_up(d, _SUBLANE) for d in dims)
        self.D = D

        self.params = []  # unpadded (W^T, b_row) kept for reference checks
        w_stack = jnp.zeros((self.num_layer, D, D), jnp.float32)
        b_stack = jnp.zeros((self.num_layer, 1, D), jnp.float32)
        for i in range(self.num_layer):
            d_in, d_out = dims[i], dims[i + 1]
            key, kw, kb = jax.random.split(key, 3)
            # Deterministic init mimicking torch.nn.Linear: U(+/- 1/sqrt(fan_in)).
            bound = 1.0 / (float(d_in) ** 0.5)
            w = jax.random.uniform(kw, (d_out, d_in), jnp.float32, -bound, bound)
            b = jax.random.uniform(kb, (d_out,), jnp.float32, -bound, bound)
            w_t = w.T  # (d_in, d_out) kernel-friendly layout
            self.params.append((w_t, b.reshape(1, d_out)))
            w_stack = w_stack.at[i, :d_in, :d_out].set(w_t)
            b_stack = b_stack.at[i, 0, :d_out].set(b)
        self.w_stack = w_stack
        self.b_stack = b_stack

        # Single jitted forward: pad -> one fused pallas_call -> slice.
        self._forward = jax.jit(self._forward_impl)

    def _forward_impl(self, x, w_stack, b_stack):
        B, d_in = x.shape
        if B > self.grid_batch_threshold:
            B_pad = _round_up(B, self.batch_tile)
            tile = self.batch_tile
        else:
            B_pad = _round_up(B, _SUBLANE)
            tile = None
        x_pad = jnp.pad(x.astype(jnp.float32),
                        ((0, B_pad - B), (0, self.D - d_in)))
        y = fused_mlp(x_pad, w_stack, b_stack,
                      precision=self.precision, batch_tile=tile)
        return y[:B, :self.output_dim]

    def __call__(self, x):
        return self._forward(x, self.w_stack, self.b_stack)


def _reference_forward(params, x):
    """Pure-JAX reference (unpadded params, same forward semantics)."""
    h = x
    n = len(params)
    for i, (w_t, b) in enumerate(params):
        h = jnp.dot(h, w_t, precision=jax.lax.Precision.HIGHEST) + b
        if i < n - 1:
            h = jnp.maximum(h, 0.0)
    return h


if __name__ == "__main__":
    key = jax.random.PRNGKey(0)
    key, k_x, k_xb, k_p = jax.random.split(key, 4)

    # Small shapes consistent with the module (DeltaZ-style MLP).
    batch, input_dim, hidden_dim, output_dim = 8, 3, 32, 3
    num_hidden_layer = 2

    # --- No-grid path (tiny batch) ---
    model = FCPallas(num_hidden_layer, input_dim, hidden_dim, output_dim, k_p)
    x = jax.random.normal(k_x, (batch, input_dim), jnp.float32)
    out = jax.block_until_ready(model(x))
    ref = _reference_forward(model.params, x)
    assert out.shape == (batch, output_dim), out.shape
    assert jnp.allclose(out, ref, atol=2e-5, rtol=2e-5), \
        float(jnp.max(jnp.abs(out - ref)))

    # --- Gridded path (larger batch per call: amortizes dispatch/DMA, uses
    #     batch tiling with VMEM-resident weights; parallel axis for v7x) ---
    model_big = FCPallas(num_hidden_layer, input_dim, hidden_dim, output_dim,
                         k_p, batch_tile=128, grid_batch_threshold=64)
    xb = jax.random.normal(k_xb, (512, input_dim), jnp.float32)
    out_b = jax.block_until_ready(model_big(xb))
    ref_b = _reference_forward(model_big.params, xb)
    assert out_b.shape == (512, output_dim), out_b.shape
    assert jnp.allclose(out_b, ref_b, atol=2e-5, rtol=2e-5), \
        float(jnp.max(jnp.abs(out_b - ref_b)))

    print("KERNEL_OK")
</pallas_src>

<mosaic_0001>
module attributes {stable_mosaic.version = 11 : i64} {
  func.func @_fused_mlp_kernel(%arg0: memref<8x32xf32, #tpu.memory_space<vmem>>, %arg1: memref<3x32x32xf32, #tpu.memory_space<vmem>>, %arg2: memref<3x1x32xf32, #tpu.memory_space<vmem>>, %arg3: memref<8x32xf32, #tpu.memory_space<vmem>>) attributes {dimension_semantics = [], scalar_prefetch = 0 : i64, scratch_operands = 0 : i64, tpu.core_type = #tpu.core_type<tc>} {
    %c0 = arith.constant 0 : index
    %c0_0 = arith.constant 0 : index
    %0 = vector.load %arg0[%c0, %c0_0] : memref<8x32xf32, #tpu.memory_space<vmem>>, vector<8x32xf32>
    %c0_1 = arith.constant 0 : index
    %c0_2 = arith.constant 0 : index
    %c0_3 = arith.constant 0 : index
    %1 = vector.load %arg1[%c0_1, %c0_2, %c0_3] : memref<3x32x32xf32, #tpu.memory_space<vmem>>, vector<1x32x32xf32>
    %2 = vector.shape_cast %1 : vector<1x32x32xf32> to vector<32x32xf32>
    %c0_4 = arith.constant 0 : index
    %c0_5 = arith.constant 0 : index
    %c0_6 = arith.constant 0 : index
    %3 = vector.load %arg2[%c0_4, %c0_5, %c0_6] : memref<3x1x32xf32, #tpu.memory_space<vmem>>, vector<1x1x32xf32>
    %4 = vector.shape_cast %3 : vector<1x1x32xf32> to vector<1x32xf32>
    %cst = arith.constant dense<0.000000e+00> : vector<8x32xf32>
    %5 = tpu.matmul %0, %2, %cst {dimension_numbers = #tpu.dot_dimension_numbers<[1], [0], [0], [1], [0, 0, 1, 1], [], []>, precision = #tpu.contract_precision<fp32>} : vector<8x32xf32>, vector<32x32xf32>, vector<8x32xf32> -> vector<8x32xf32>
    %6 = vector.broadcast %4 : vector<1x32xf32> to vector<8x32xf32>
    %7 = arith.addf %5, %6 : vector<8x32xf32>
    %cst_7 = arith.constant 0.000000e+00 : f32
    %8 = vector.broadcast %cst_7 : f32 to vector<8x32xf32>
    %9 = arith.maximumf %7, %8 : vector<8x32xf32>
    %c1 = arith.constant 1 : index
    %c0_8 = arith.constant 0 : index
    %c0_9 = arith.constant 0 : index
    %10 = vector.load %arg1[%c1, %c0_8, %c0_9] : memref<3x32x32xf32, #tpu.memory_space<vmem>>, vector<1x32x32xf32>
    %11 = vector.shape_cast %10 : vector<1x32x32xf32> to vector<32x32xf32>
    %c1_10 = arith.constant 1 : index
    %c0_11 = arith.constant 0 : index
    %c0_12 = arith.constant 0 : index
    %12 = vector.load %arg2[%c1_10, %c0_11, %c0_12] : memref<3x1x32xf32, #tpu.memory_space<vmem>>, vector<1x1x32xf32>
    %13 = vector.shape_cast %12 : vector<1x1x32xf32> to vector<1x32xf32>
    %cst_13 = arith.constant dense<0.000000e+00> : vector<8x32xf32>
    %14 = tpu.matmul %9, %11, %cst_13 {dimension_numbers = #tpu.dot_dimension_numbers<[1], [0], [0], [1], [0, 0, 1, 1], [], []>, precision = #tpu.contract_precision<fp32>} : vector<8x32xf32>, vector<32x32xf32>, vector<8x32xf32> -> vector<8x32xf32>
    %15 = vector.broadcast %13 : vector<1x32xf32> to vector<8x32xf32>
    %16 = arith.addf %14, %15 : vector<8x32xf32>
    %cst_14 = arith.constant 0.000000e+00 : f32
    %17 = vector.broadcast %cst_14 : f32 to vector<8x32xf32>
    %18 = arith.maximumf %16, %17 : vector<8x32xf32>
    %c2 = arith.constant 2 : index
    %c0_15 = arith.constant 0 : index
    %c0_16 = arith.constant 0 : index
    %19 = vector.load %arg1[%c2, %c0_15, %c0_16] : memref<3x32x32xf32, #tpu.memory_space<vmem>>, vector<1x32x32xf32>
    %20 = vector.shape_cast %19 : vector<1x32x32xf32> to vector<32x32xf32>
    %c2_17 = arith.constant 2 : index
    %c0_18 = arith.constant 0 : index
    %c0_19 = arith.constant 0 : index
    %21 = vector.load %arg2[%c2_17, %c0_18, %c0_19] : memref<3x1x32xf32, #tpu.memory_space<vmem>>, vector<1x1x32xf32>
    %22 = vector.shape_cast %21 : vector<1x1x32xf32> to vector<1x32xf32>
    %cst_20 = arith.constant dense<0.000000e+00> : vector<8x32xf32>
    %23 = tpu.matmul %18, %20, %cst_20 {dimension_numbers = #tpu.dot_dimension_numbers<[1], [0], [0], [1], [0, 0, 1, 1], [], []>, precision = #tpu.contract_precision<fp32>} : vector<8x32xf32>, vector<32x32xf32>, vector<8x32xf32> -> vector<8x32xf32>
    %24 = vector.broadcast %22 : vector<1x32xf32> to vector<8x32xf32>
    %25 = arith.addf %23, %24 : vector<8x32xf32>
    %c0_21 = arith.constant 0 : index
    %c0_22 = arith.constant 0 : index
    %26 = vector.load %arg3[%c0_21, %c0_22] : memref<8x32xf32, #tpu.memory_space<vmem>>, vector<8x32xf32>
    tpu.vector_store %arg3[%c0_21, %c0_22], %25 {strides = array<i32>} : memref<8x32xf32, #tpu.memory_space<vmem>>, vector<8x32xf32>,
    return
  }
}

</mosaic_0001>

<bundles_post_ra>
// kernel: _forward_impl.1
= control target key start
LH: loop header
LB: loop body
LE: loop exit
PB: predicated region body
PF: predicated region fallthrough
CT: control target
= control target key end

     0   :  { %8 = vsyncpa [#allocation3], 0  ;;  %s1859_s12 = smov [#allocation2]   ;;  %s2164_s0 = inlined_call_operand.vmem [shape: f32[8,32], index: 0, kind: input, shape index: {}]   ;;  %s2165_s1 = inlined_call_operand.hbm [shape: f32[3,32,32], index: 1, kind: input, shape index: {}]   ;;  %s2166_s2 = inlined_call_operand.vmem [shape: f32[3,1,32], index: 2, kind: input, shape index: {}]   ;;  %s2167_s3 = inlined_call_operand.vmem [shape: f32[8,32], index: 3, kind: output, shape index: {}]  }
   0x1   :  { %s16_s13 = sshll.u32 %s1859_s12, 4  ;;  %s17_s13 = int_to_ptr.vmem [resolvable:$true] %s16_s13 }
   0x2   :  { %s1845_s14 = scalar_lea.vmem %s17_s13, 1536  ;;  %p1850_p1 = scmp.lt.s32.totalorder %s17_s13, %s17_s13 }
   0x3   :  { %p1846_p0 = scmp.ne.s32.totalorder %s17_s13, %s1845_s14  ;;  %p1851_p2 = scmp.lt.s32.totalorder %s1845_s14, %s1845_s14 }
   0x5   :  { %p1852_p3 = por %p1851_p2, %p1850_p1 }
   0x7   :  { %p1853_p4 = pnand %p1852_p3, %p1846_p0 }
   0x9   :  { %1856 = shalt.err (!%p1853_p4)
}
   0xa   :  { %s1860_s15 = smov 128   ;;  %s1861_s16 = smov 8  }
   0xb   :  { %22 = dma.hbm_to_vmem [thread:$0]  %s2165_s1, 1536, %s17_s13, [#allocation3], %s1860_s15, %s1860_s15, %s1861_s16  }
   0xc   :  { %1857 = dma.done.wait [#allocation3], 1536  }
   0xd   :  { %1858 = vsyncadd [#allocation3], 4294965760  ;;  %v1862_v0 = vmov 0.0   ;;  %vm1863_vm0 = vmmov 0   ;;  %vm40_vm1 = vcmask 261120   ;;  %v32_v1 = vld [vmem:[#allocation2 + $0x18] sm:$0xff] }
   0xe   :  { %1634 = vmatprep.subr.mxu0 %v1862_v0  ;;  %1645 = vmatprep.subr.mxu1 %v1862_v0  ;;  %v31_v2 = vld [vmem:[#allocation2 + $0x10] sm:$0xff]  ;;  %v30_v3 = vld [vmem:[#allocation2 + $0x8] sm:$0xff]  ;;  %v1893_v4 = vand.u32 4294901760, %v32_v1  ;;  %v29_v7 = vld [vmem:[#allocation2] sm:$0xff] }
   0xf   :  { %1642 = vmatprep.mubr.msk.f32.mxu0 %vm1863_vm0, %v1862_v0  ;;  %1653 = vmatprep.mubr.msk.f32.mxu1 %vm1863_vm0, %v1862_v0  ;;  %v1895_v5 = vand.u32 4294901760, %v31_v2  ;;  %v1897_v6 = vand.u32 4294901760, %v30_v3  ;;  %v28_v8 = vld [vmem:[%s2164_s0] sm:$0xff]  ;;  %v1902_v9 = vand.u32 4294901760, %v29_v7  ;;  %v534_v32 = vld [vmem:[#allocation2 + $0x38] sm:$0xff]  ;;  %v533_v34 = vld [vmem:[#allocation2 + $0x30] sm:$0xff] }
  0x10   :  { %v42_v10 = vsel %vm40_vm1, %v28_v8, 0  ;;  %1635 = vmatpush3.msra.mxu0 %v1893_v4  ;;  %v149_v11 = vsub.f32 %v32_v1, %v1893_v4  ;;  %v1963_v33 = vand.u32 4294901760, %v534_v32  ;;  %v1968_v36 = vand.u32 4294901760, %v533_v34  ;;  %v532_v37 = vld [vmem:[#allocation2 + $0x28] sm:$0xff]  ;;  %v531_v41 = vld [vmem:[#allocation2 + $0x20] sm:$0xff] }
  0x11   :  { %v1907_v12 = vand.u32 4294901760, %v42_v10  ;;  %v156_v13 = vsub.f32 %v31_v2, %v1895_v5  ;;  %v163_v14 = vsub.f32 %v30_v3, %v1897_v6  ;;  %1636 = vmatprep.subr.mxu0 %v1862_v0  ;;  %v170_v15 = vsub.f32 %v29_v7, %v1902_v9  ;;  %v1539_v59 = vld [vmem:[%s2166_s2] ss:$0 sm:$0xff] }
  0x12   :  { %1637 = vmatpush3.msra.mxu0 %v1895_v5  ;;  %v150_v16 = vand.u32 4294901760, %v149_v11  ;;  %v1966_v35 = vsub.f32 %v534_v32, %v1963_v33  ;;  %v1974_v39 = vsub.f32 %v533_v34, %v1968_v36  ;;  %v1976_v40 = vand.u32 4294901760, %v532_v37 }
  0x13   :  { %v114_v17 = vsub.f32 %v42_v10, %v1907_v12  ;;  %v157_v18 = vand.u32 4294901760, %v156_v13  ;;  %v164_v19 = vand.u32 4294901760, %v163_v14  ;;  %1638 = vmatprep.subr.mxu0 %v1862_v0  ;;  %v171_v20 = vand.u32 4294901760, %v170_v15 }
  0x14   :  { %1639 = vmatpush3.msra.mxu0 %v1897_v6  ;;  %v151_v21 = vsub.f32 %v149_v11, %v150_v16  ;;  %v652_v38 = vand.u32 4294901760, %v1966_v35  ;;  %v659_v43 = vand.u32 4294901760, %v1974_v39  ;;  %v1985_v44 = vsub.f32 %v532_v37, %v1976_v40 }
  0x15   :  { %v115_v22 = vand.u32 4294901760, %v114_v17  ;;  %v158_v23 = vsub.f32 %v156_v13, %v157_v18  ;;  %v165_v24 = vsub.f32 %v163_v14, %v164_v19  ;;  %1640 = vmatprep.subr.mxu0 %v1862_v0  ;;  %v172_v28 = vsub.f32 %v170_v15, %v171_v20 }
  0x16   :  { %1641 = vmatpush3.msra.mxu0 %v1902_v9  ;;  %v152_v25 = vand.u32 4294901760, %v151_v21  ;;  %v653_v42 = vsub.f32 %v1966_v35, %v652_v38  ;;  %v1987_v45 = vand.u32 4294901760, %v531_v41  ;;  %v660_v47 = vsub.f32 %v1974_v39, %v659_v43  ;;  %v1035_v21 = vld [vmem:[#allocation2 + $0x50] sm:$0xff] }
  0x17   :  { %v116_v26 = vsub.f32 %v114_v17, %v115_v22  ;;  %v159_v27 = vand.u32 4294901760, %v158_v23  ;;  %1656 = vmatprep.subr.mxu0 %v1862_v0  ;;  %v166_v30 = vand.u32 4294901760, %v165_v24  ;;  %v173_v31 = vand.u32 4294901760, %v172_v28  ;;  %v1034_v24 = vld [vmem:[#allocation2 + $0x48] sm:$0xff]  ;;  %v1033_v28 = vld [vmem:[#allocation2 + $0x40] sm:$0xff] }
  0x18   :  { %1646 = vmatpush3.msra.mxu1 %v152_v25  ;;  %v654_v46 = vand.u32 4294901760, %v653_v42  ;;  %v666_v48 = vand.u32 4294901760, %v1985_v44  ;;  %v1996_v49 = vsub.f32 %v531_v41, %v1987_v45  ;;  %v661_v50 = vand.u32 4294901760, %v660_v47 }
  0x19   :  { %v117_v29 = vand.u32 4294901760, %v116_v26  ;;  %1647 = vmatprep.subr.mxu1 %v1862_v0  ;;  %v2068_v23 = vand.u32 4294901760, %v1035_v21  ;;  %v2087_v32 = vand.u32 4294901760, %v1033_v28 }
  0x1a   :  { %1648 = vmatpush3.msra.mxu1 %v159_v27  ;;  %v667_v51 = vsub.f32 %v1985_v44, %v666_v48  ;;  %v673_v52 = vand.u32 4294901760, %v1996_v49  ;;  %v2076_v27 = vand.u32 4294901760, %v1034_v24 }
  0x1b   :  { %1643 = vmatmul.mubr.f32.vlgmr.msra.gmra.mxu0 %v117_v29  ;;  %1649 = vmatprep.subr.mxu1 %v1862_v0  ;;  %v2074_v26 = vsub.f32 %v1035_v21, %v2068_v23 }
  0x1c   :  { %1657 = vmatpush3.msra.mxu0 %v149_v11  ;;  %1650 = vmatpush3.msra.mxu1 %v166_v30  ;;  %v668_v53 = vand.u32 4294901760, %v667_v51  ;;  %v674_v54 = vsub.f32 %v1996_v49, %v673_v52 }
  0x1d   :  { %1658 = vmatprep.subr.mxu0 %v1862_v0  ;;  %1651 = vmatprep.subr.mxu1 %v1862_v0  ;;  %v1161_v30 = vand.u32 4294901760, %v2074_v26 }
  0x1e   :  { %1659 = vmatpush3.msra.mxu0 %v156_v13  ;;  %1652 = vmatpush3.msra.mxu1 %v173_v31  ;;  %v675_v55 = vand.u32 4294901760, %v674_v54  ;;  %v2085_v31 = vsub.f32 %v1034_v24, %v2076_v27 }
  0x1f   :  { %1660 = vmatprep.subr.mxu0 %v1862_v0  ;;  %1654 = vmatmul.mubr.f32.vlgmr.msra.gmra.mxu1 %v1907_v12  ;;  %v1162_v34 = vsub.f32 %v2074_v26, %v1161_v30 }
  0x20   :  { %1661 = vmatpush3.msra.mxu0 %v163_v14  ;;  %1667 = vmatprep.subr.mxu1 %v1862_v0 }
  0x21   :  { %1662 = vmatprep.subr.mxu0 %v1862_v0  ;;  %1668 = vmatpush3.msra.mxu1 %v1893_v4  ;;  %v1163_v37 = vand.u32 4294901760, %v1162_v34 }
  0x22   :  { %1663 = vmatpush3.msra.mxu0 %v170_v15  ;;  %1664 = vmatprep.mubr.msk.f32.mxu0 %vm1863_vm0, %v1862_v0 }
  0x23   :  { %1669 = vmatprep.subr.mxu1 %v1862_v0  ;;  %1678 = vmatprep.subr.mxu0 %v1862_v0 }
  0x24   :  { %1665 = vmatmul.mubr.f32.vlgmr.msra.gmra.mxu0 %v114_v17  ;;  %1670 = vmatpush3.msra.mxu1 %v1895_v5 }
  0x25   :  { %1679 = vmatpush3.msra.mxu0 %v150_v16  ;;  %1671 = vmatprep.subr.mxu1 %v1862_v0 }
  0x26   :  { %1680 = vmatprep.subr.mxu0 %v1862_v0  ;;  %1672 = vmatpush3.msra.mxu1 %v1897_v6 }
  0x27   :  { %1681 = vmatpush3.msra.mxu0 %v157_v18  ;;  %1673 = vmatprep.subr.mxu1 %v1862_v0 }
  0x28   :  { %1682 = vmatprep.subr.mxu0 %v1862_v0  ;;  %1674 = vmatpush3.msra.mxu1 %v1902_v9 }
  0x29   :  { %1675 = vmatprep.mubr.msk.f32.mxu1 %vm1863_vm0, %v1862_v0  ;;  %1683 = vmatpush3.msra.mxu0 %v164_v19  ;;  %v1036_v19 = vld [vmem:[#allocation2 + $0x58] sm:$0xff] }
  0x2a   :  { %1676 = vmatmul.mubr.f32.vlgmr.msra.gmra.mxu1 %v115_v22  ;;  %1684 = vmatprep.subr.mxu0 %v1862_v0 }
  0x2b   :  { %1689 = vmatprep.subr.mxu1 %v1862_v0  ;;  %1685 = vmatpush3.msra.mxu0 %v171_v20  ;;  %v2063_v20 = vand.u32 4294901760, %v1036_v19 }
  0x2c   :  { %1686 = vmatprep.mubr.msk.f32.mxu0 %vm1863_vm0, %v1862_v0  ;;  %1690 = vmatpush3.msra.mxu1 %v1893_v4 }
  0x2d   :  { %1687 = vmatmul.mubr.f32.vlgmr.msra.gmra.mxu0 %v1907_v12  ;;  %1691 = vmatprep.subr.mxu1 %v1862_v0  ;;  %v2066_v22 = vsub.f32 %v1036_v19, %v2063_v20 }
  0x2e   :  { %1697 = vmatprep.mubr.msk.f32.mxu1 %vm1863_vm0, %v1862_v0  ;;  %1692 = vmatpush3.msra.mxu1 %v1895_v5 }
  0x2f   :  { %1700 = vmatprep.subr.mxu0 %v1862_v0  ;;  %1693 = vmatprep.subr.mxu1 %v1862_v0  ;;  %v1154_v25 = vand.u32 4294901760, %v2066_v22 }
  0x30   :  { %1708 = vmatprep.mubr.msk.f32.mxu0 %vm1863_vm0, %v1862_v0  ;;  %1694 = vmatpush3.msra.mxu1 %v1897_v6 }
  0x31   :  { %1695 = vmatprep.subr.mxu1 %v1862_v0  ;;  %1701 = vmatpush3.msra.mxu0 %v1963_v33  ;;  %v1155_v29 = vsub.f32 %v2066_v22, %v1154_v25 }
  0x32   :  { %1696 = vmatpush3.msra.mxu1 %v1902_v9  ;;  %1702 = vmatprep.subr.mxu0 %v1862_v0 }
  0x33   :  { %1698 = vmatmul.mubr.f32.vlgmr.msra.gmra.mxu1 %v1907_v12  ;;  %1711 = vmatprep.subr.mxu1 %v1862_v0 }
  0x34   :  { %1719 = vmatprep.mubr.msk.f32.mxu1 %vm1863_vm0, %v1862_v0  ;;  %1703 = vmatpush3.msra.mxu0 %v1968_v36 }
  0x35   :  { %1704 = vmatprep.subr.mxu0 %v1862_v0  ;;  %1712 = vmatpush3.msra.mxu1 %v654_v46 }
  0x36   :  { %1705 = vmatpush3.msra.mxu0 %v1976_v40  ;;  %1713 = vmatprep.subr.mxu1 %v1862_v0 }
  0x37   :  { %1706 = vmatprep.subr.mxu0 %v1862_v0  ;;  %1714 = vmatpush3.msra.mxu1 %v661_v50 }
  0x38   :  { %1707 = vmatpush3.msra.mxu0 %v1987_v45  ;;  %1715 = vmatprep.subr.mxu1 %v1862_v0 }
  0x39   :  { %1722 = vmatprep.subr.mxu0 %v1862_v0  ;;  %1716 = vmatpush3.msra.mxu1 %v668_v53 }
  0x3a   :  { %1717 = vmatprep.subr.mxu1 %v1862_v0 }
  0x3b   :  { %1718 = vmatpush3.msra.mxu1 %v675_v55 }
  0x3c   :  { %1733 = vmatprep.subr.mxu1 %v1862_v0 }
  0xdb   :  { %v119_v56 = vpop.f32.mrf.mxu0 }
  0xdc   :  { %v120_v62 = vadd.f32 %v1539_v59, %v119_v56 }
  0xdd   :  { %v1644_v57 = vpop.f32.mrf.mxu0 }
  0xdf   :  { %v210_v58 = vpop.f32.mrf.mxu1 }
  0xe0   :  { %v211_v1 = vadd.f32 %v210_v58, %v120_v62 }
  0xe1   :  { %v1655_v60 = vpop.f32.mrf.mxu1 }
  0xe4   :  { %v290_v61 = vpop.f32.mrf.mxu0 }
  0xe5   :  { %v291_v4 = vadd.f32 %v290_v61, %v211_v1 }
  0xe6   :  { %v1666_v63 = vpop.f32.mrf.mxu0 }
  0xea   :  { %v367_v2 = vpop.f32.mrf.mxu1 }
  0xeb   :  { %v368_v6 = vadd.f32 %v367_v2, %v291_v4 }
  0xec   :  { %v1677_v3 = vpop.f32.mrf.mxu1 }
  0xed   :  { %v450_v5 = vpop.f32.mrf.mxu0 }
  0xee   :  { %v451_v8 = vadd.f32 %v450_v5, %v368_v6 }
  0xef   :  { %v1688_v7 = vpop.f32.mrf.mxu0 }
  0xf3   :  { %v525_v9 = vpop.f32.mrf.mxu1 }
  0xf4   :  { %v526_v10 = vadd.f32 %v525_v9, %v451_v8 }
  0xf5   :  { %v1699_v11 = vpop.f32.mrf.mxu1 }
  0xf6   :  { %v529_v12 = vmax.f32 %v526_v10, 0.0 }
  0xf8   :  { %v544_v13 = vsel %vm40_vm1, %v529_v12, 0  ;;  %v1543_v12 = vld [vmem:[%s2166_s2 + $0x2] ss:$0 sm:$0xff] }
  0xf9   :  { %v615_v14 = vand.u32 4294901760, %v544_v13 }
  0xfb   :  { %v616_v15 = vsub.f32 %v544_v13, %v615_v14  ;;  %1720 = vmatmul.mubr.f32.vlgmr.msra.gmra.mxu1 %v615_v14 }
  0xfc   :  { %1734 = vmatpush3.msra.mxu1 %v1963_v33  ;;  %1741 = vmatprep.mubr.msk.f32.mxu1 %vm1863_vm0, %v1862_v0 }
  0xfd   :  { %1735 = vmatprep.subr.mxu1 %v1862_v0  ;;  %v617_v16 = vand.u32 4294901760, %v616_v15 }
  0xfe   :  { %1736 = vmatpush3.msra.mxu1 %v1968_v36 }
  0xff   :  { %1737 = vmatprep.subr.mxu1 %v1862_v0  ;;  %v618_v17 = vsub.f32 %v616_v15, %v617_v16 }
 0x100   :  { %1738 = vmatpush3.msra.mxu1 %v1976_v40 }
 0x101   :  { %1739 = vmatprep.subr.mxu1 %v1862_v0  ;;  %v619_v18 = vand.u32 4294901760, %v618_v17 }
 0x102   :  { %1740 = vmatpush3.msra.mxu1 %v1987_v45 }
 0x103   :  { %1742 = vmatmul.mubr.f32.vlgmr.msra.gmra.mxu1 %v617_v16  ;;  %1755 = vmatprep.subr.mxu1 %v1862_v0 }
 0x104   :  { %1709 = vmatmul.mubr.f32.vlgmr.msra.gmra.mxu0 %v619_v18  ;;  %1756 = vmatpush3.msra.mxu1 %v1963_v33  ;;  %v1156_v33 = vand.u32 4294901760, %v1155_v29 }
 0x105   :  { %1723 = vmatpush3.msra.mxu0 %v1966_v35  ;;  %1757 = vmatprep.subr.mxu1 %v1862_v0  ;;  %v1168_v35 = vand.u32 4294901760, %v2085_v31 }
 0x106   :  { %1724 = vmatprep.subr.mxu0 %v1862_v0  ;;  %1758 = vmatpush3.msra.mxu1 %v1968_v36  ;;  %v2096_v36 = vsub.f32 %v1033_v28, %v2087_v32 }
 0x107   :  { %1725 = vmatpush3.msra.mxu0 %v1974_v39  ;;  %1759 = vmatprep.subr.mxu1 %v1862_v0 }
 0x108   :  { %1726 = vmatprep.subr.mxu0 %v1862_v0  ;;  %1760 = vmatpush3.msra.mxu1 %v1976_v40  ;;  %v1175_v39 = vand.u32 4294901760, %v2096_v36 }
 0x109   :  { %1727 = vmatpush3.msra.mxu0 %v1985_v44  ;;  %1761 = vmatprep.subr.mxu1 %v1862_v0 }
 0x10a   :  { %1728 = vmatprep.subr.mxu0 %v1862_v0  ;;  %1730 = vmatprep.mubr.msk.f32.mxu0 %vm1863_vm0, %v1862_v0  ;;  %v1176_v41 = vsub.f32 %v2096_v36, %v1175_v39 }
 0x10b   :  { %1729 = vmatpush3.msra.mxu0 %v1996_v49  ;;  %1762 = vmatpush3.msra.mxu1 %v1987_v45  ;;  %v1541_v49 = vld [vmem:[%s2166_s2 + $0x1] ss:$0 sm:$0xff] }
 0x10c   :  { %1763 = vmatprep.mubr.msk.f32.mxu1 %vm1863_vm0, %v1862_v0  ;;  %1731 = vmatmul.mubr.f32.vlgmr.msra.gmra.mxu0 %v616_v15  ;;  %v1177_v42 = vand.u32 4294901760, %v1176_v41 }
 0x10d   :  { %1744 = vmatprep.subr.mxu0 %v1862_v0  ;;  %1764 = vmatmul.mubr.f32.vlgmr.msra.gmra.mxu1 %v615_v14 }
 0x10e   :  { %1745 = vmatpush3.msra.mxu0 %v652_v38  ;;  %1752 = vmatprep.mubr.msk.f32.mxu0 %vm1863_vm0, %v1862_v0  ;;  %v1169_v38 = vsub.f32 %v2085_v31, %v1168_v35 }
 0x10f   :  { %1746 = vmatprep.subr.mxu0 %v1862_v0  ;;  %1777 = vmatprep.subr.mxu1 %v1862_v0 }
 0x110   :  { %1747 = vmatpush3.msra.mxu0 %v659_v43  ;;  %1785 = vmatprep.mubr.msk.f32.mxu1 %vm1863_vm0, %v1862_v0  ;;  %v1170_v40 = vand.u32 4294901760, %v1169_v38 }
 0x111   :  { %1748 = vmatprep.subr.mxu0 %v1862_v0  ;;  %1778 = vmatpush3.msra.mxu1 %v1156_v33 }
 0x112   :  { %1749 = vmatpush3.msra.mxu0 %v666_v48  ;;  %1779 = vmatprep.subr.mxu1 %v1862_v0 }
 0x113   :  { %1750 = vmatprep.subr.mxu0 %v1862_v0  ;;  %1780 = vmatpush3.msra.mxu1 %v1163_v37 }
 0x114   :  { %1751 = vmatpush3.msra.mxu0 %v673_v52  ;;  %1781 = vmatprep.subr.mxu1 %v1862_v0 }
 0x115   :  { %1753 = vmatmul.mubr.f32.vlgmr.msra.gmra.mxu0 %v615_v14  ;;  %1766 = vmatprep.subr.mxu0 %v1862_v0 }
 0x116   :  { %1774 = vmatprep.mubr.msk.f32.mxu0 %vm1863_vm0, %v1862_v0  ;;  %1767 = vmatpush3.msra.mxu0 %v2063_v20 }
 0x117   :  { %1768 = vmatprep.subr.mxu0 %v1862_v0  ;;  %1782 = vmatpush3.msra.mxu1 %v1170_v40 }
 0x118   :  { %1769 = vmatpush3.msra.mxu0 %v2068_v23  ;;  %1783 = vmatprep.subr.mxu1 %v1862_v0 }
 0x119   :  { %1770 = vmatprep.subr.mxu0 %v1862_v0  ;;  %1784 = vmatpush3.msra.mxu1 %v1177_v42 }
 0x11a   :  { %1771 = vmatpush3.msra.mxu0 %v2076_v27  ;;  %1799 = vmatprep.subr.mxu1 %v1862_v0 }
 0x11b   :  { %1772 = vmatprep.subr.mxu0 %v1862_v0 }
 0x11c   :  { %1773 = vmatpush3.msra.mxu0 %v2087_v32 }
 0x11d   :  { %1788 = vmatprep.subr.mxu0 %v1862_v0 }
 0x1bb   :  { %v712_v43 = vpop.f32.mrf.mxu1 }
 0x1bd   :  { %v1721_v44 = vpop.f32.mrf.mxu1 }
 0x1c3   :  { %v869_v45 = vpop.f32.mrf.mxu1 }
 0x1c4   :  { %v621_v46 = vpop.f32.mrf.mxu0 }
 0x1c5   :  { %v1743_v47 = vpop.f32.mrf.mxu1  ;;  %v622_v50 = vadd.f32 %v1541_v49, %v621_v46 }
 0x1c6   :  { %v1710_v48 = vpop.f32.mrf.mxu0 }
 0x1c7   :  { %v713_v53 = vadd.f32 %v712_v43, %v622_v50 }
 0x1cc   :  { %v792_v51 = vpop.f32.mrf.mxu0 }
 0x1cd   :  { %v1027_v52 = vpop.f32.mrf.mxu1  ;;  %v793_v56 = vadd.f32 %v792_v51, %v713_v53 }
 0x1ce   :  { %v1732_v54 = vpop.f32.mrf.mxu0 }
 0x1cf   :  { %v1765_v55 = vpop.f32.mrf.mxu1  ;;  %v870_v57 = vadd.f32 %v869_v45, %v793_v56 }
 0x1d5   :  { %v952_v58 = vpop.f32.mrf.mxu0 }
 0x1d6   :  { %v953_v59 = vadd.f32 %v952_v58, %v870_v57 }
 0x1d7   :  { %v1754_v60 = vpop.f32.mrf.mxu0 }
 0x1d8   :  { %v1028_v61 = vadd.f32 %v1027_v52, %v953_v59 }
 0x1da   :  { %v1031_v62 = vmax.f32 %v1028_v61, 0.0 }
 0x1dc   :  { %v1046_v63 = vsel %vm40_vm1, %v1031_v62, 0 }
 0x1dd   :  { %v1117_v1 = vand.u32 4294901760, %v1046_v63 }
 0x1df   :  { %v1118_v2 = vsub.f32 %v1046_v63, %v1117_v1  ;;  %1786 = vmatmul.mubr.f32.vlgmr.msra.gmra.mxu1 %v1117_v1 }
 0x1e0   :  { %1800 = vmatpush3.msra.mxu1 %v2063_v20  ;;  %1807 = vmatprep.mubr.msk.f32.mxu1 %vm1863_vm0, %v1862_v0 }
 0x1e1   :  { %1801 = vmatprep.subr.mxu1 %v1862_v0  ;;  %v1119_v3 = vand.u32 4294901760, %v1118_v2 }
 0x1e2   :  { %1802 = vmatpush3.msra.mxu1 %v2068_v23 }
 0x1e3   :  { %1803 = vmatprep.subr.mxu1 %v1862_v0  ;;  %v1120_v4 = vsub.f32 %v1118_v2, %v1119_v3 }
 0x1e4   :  { %1804 = vmatpush3.msra.mxu1 %v2076_v27 }
 0x1e5   :  { %1805 = vmatprep.subr.mxu1 %v1862_v0  ;;  %v1121_v5 = vand.u32 4294901760, %v1120_v4 }
 0x1e6   :  { %1806 = vmatpush3.msra.mxu1 %v2087_v32 }
 0x1e7   :  { %1808 = vmatmul.mubr.f32.vlgmr.msra.gmra.mxu1 %v1119_v3  ;;  %1821 = vmatprep.subr.mxu1 %v1862_v0 }
 0x1e8   :  { %1775 = vmatmul.mubr.f32.vlgmr.msra.gmra.mxu0 %v1121_v5  ;;  %1822 = vmatpush3.msra.mxu1 %v2063_v20 }
 0x1e9   :  { %1789 = vmatpush3.msra.mxu0 %v2066_v22  ;;  %1823 = vmatprep.subr.mxu1 %v1862_v0 }
 0x1ea   :  { %1790 = vmatprep.subr.mxu0 %v1862_v0  ;;  %1824 = vmatpush3.msra.mxu1 %v2068_v23 }
 0x1eb   :  { %1791 = vmatpush3.msra.mxu0 %v2074_v26  ;;  %1825 = vmatprep.subr.mxu1 %v1862_v0 }
 0x1ec   :  { %1792 = vmatprep.subr.mxu0 %v1862_v0  ;;  %1826 = vmatpush3.msra.mxu1 %v2076_v27 }
 0x1ed   :  { %1793 = vmatpush3.msra.mxu0 %v2085_v31  ;;  %1827 = vmatprep.subr.mxu1 %v1862_v0 }
 0x1ee   :  { %1794 = vmatprep.subr.mxu0 %v1862_v0  ;;  %1796 = vmatprep.mubr.msk.f32.mxu0 %vm1863_vm0, %v1862_v0 }
 0x1ef   :  { %1795 = vmatpush3.msra.mxu0 %v2096_v36  ;;  %1828 = vmatpush3.msra.mxu1 %v2087_v32 }
 0x1f0   :  { %1829 = vmatprep.mubr.msk.f32.mxu1 %vm1863_vm0, %v1862_v0  ;;  %1797 = vmatmul.mubr.f32.vlgmr.msra.gmra.mxu0 %v1118_v2 }
 0x1f1   :  { %1810 = vmatprep.subr.mxu0 %v1862_v0  ;;  %1830 = vmatmul.mubr.f32.vlgmr.msra.gmra.mxu1 %v1117_v1 }
 0x1f2   :  { %1811 = vmatpush3.msra.mxu0 %v1154_v25  ;;  %1818 = vmatprep.mubr.msk.f32.mxu0 %vm1863_vm0, %v1862_v0 }
 0x1f3   :  { %1812 = vmatprep.subr.mxu0 %v1862_v0 }
 0x1f4   :  { %1813 = vmatpush3.msra.mxu0 %v1161_v30 }
 0x1f5   :  { %1814 = vmatprep.subr.mxu0 %v1862_v0 }
 0x1f6   :  { %1815 = vmatpush3.msra.mxu0 %v1168_v35 }
 0x1f7   :  { %1816 = vmatprep.subr.mxu0 %v1862_v0 }
 0x1f8   :  { %1817 = vmatpush3.msra.mxu0 %v1175_v39 }
 0x1f9   :  { %1819 = vmatmul.mubr.f32.vlgmr.msra.gmra.mxu0 %v1117_v1 }
 0x29f   :  { %v1214_v6 = vpop.f32.mrf.mxu1 }
 0x2a1   :  { %v1787_v7 = vpop.f32.mrf.mxu1 }
 0x2a7   :  { %v1371_v8 = vpop.f32.mrf.mxu1 }
 0x2a8   :  { %v1123_v9 = vpop.f32.mrf.mxu0 }
 0x2a9   :  { %v1809_v10 = vpop.f32.mrf.mxu1  ;;  %v1124_v13 = vadd.f32 %v1543_v12, %v1123_v9 }
 0x2aa   :  { %v1776_v11 = vpop.f32.mrf.mxu0 }
 0x2ab   :  { %v1215_v16 = vadd.f32 %v1214_v6, %v1124_v13 }
 0x2b0   :  { %v1294_v14 = vpop.f32.mrf.mxu0 }
 0x2b1   :  { %v1529_v15 = vpop.f32.mrf.mxu1  ;;  %v1295_v18 = vadd.f32 %v1294_v14, %v1215_v16 }
 0x2b2   :  { %v1798_v17 = vpop.f32.mrf.mxu0 }
 0x2b3   :  { %v1831_v0 = vpop.f32.mrf.mxu1  ;;  %v1372_v19 = vadd.f32 %v1371_v8, %v1295_v18 }
 0x2b9   :  { %v1454_v20 = vpop.f32.mrf.mxu0 }
 0x2ba   :  { %v1455_v21 = vadd.f32 %v1454_v20, %v1372_v19 }
 0x2bb   :  { %v1820_v22 = vpop.f32.mrf.mxu0 }
 0x2bc   :  { %v1530_v23 = vadd.f32 %v1529_v15, %v1455_v21 }
 0x2be   :  { %1533 = vst.msk [vmem:[%s2167_s3] sm:$0xff] %vm40_vm1, %v1530_v23 }
 0x2bf   :  { %1538 = vsyncpa [#allocation3], 1 }

</bundles_post_ra>
